<compile_context>
chip_gen: v7x
topology: tpu7x:2x2x1
jax: 0.10.0
libtpu: 0.0.40
codegen_flags: <defaults>
</compile_context>

<pallas_src>
import functools

import jax
import jax.numpy as jnp
from jax.experimental import pallas as pl
from jax.experimental.pallas import tpu as pltpu

LANES = 128   # hidden feature padding (79 -> 128, 36 -> 128), VMEM-side only
IN_PAD = 8    # input features 3 -> 8 (one sublane group, narrow HBM block)
OUT_PAD = 8   # output features 3 -> 8 (narrow HBM writeback block)


def mlp3_kernel(x_ref, w1_ref, b1_ref, w2_ref, b2_ref, w3_ref, b3_ref, o_ref):
    # One batch tile through three fused matmul + bias (+ReLU) stages.
    x = x_ref[...]                                                          # (TB, 8)
    h1 = jnp.dot(x, w1_ref[...], preferred_element_type=jnp.float32) + b1_ref[...]
    h1 = jnp.maximum(h1, 0.0)                                               # (TB, 128)
    h2 = jnp.dot(h1, w2_ref[...], preferred_element_type=jnp.float32) + b2_ref[...]
    h2 = jnp.maximum(h2, 0.0)                                               # (TB, 128)
    h3 = jnp.dot(h2, w3_ref[...], preferred_element_type=jnp.float32) + b3_ref[...]
    o_ref[...] = h3.astype(o_ref.dtype)                                     # (TB, 8)


def _pad2d(a, rows, cols):
    """Zero-pad a 2-D array up to (rows, cols)."""
    out = jnp.zeros((rows, cols), a.dtype)
    return out.at[: a.shape[0], : a.shape[1]].set(a)


def _round_up(x, m):
    return ((x + m - 1) // m) * m


def pad_params(params):
    """Pad weights/biases once (hoisted out of the per-forward path)."""
    w1, b1, w2, b2, w3, b3 = params
    return (
        _pad2d(w1, IN_PAD, LANES),    # (8, 128)
        _pad2d(b1, 1, LANES),         # (1, 128)
        _pad2d(w2, LANES, LANES),     # (128, 128)
        _pad2d(b2, 1, LANES),         # (1, 128)
        _pad2d(w3, LANES, OUT_PAD),   # (128, 8)
        _pad2d(b3, 1, OUT_PAD),       # (1, 8)
    )


@functools.partial(jax.jit, static_argnames=("tb",))
def mlp3_forward(x, padded_params, *, tb=1024):
    """x: [B, 3] f32; padded_params: output of pad_params(init_params(...))."""
    w1p, b1p, w2p, b2p, w3p, b3p = padded_params
    B, _ = x.shape

    # Batch tile: multiple of 8 sublanes, capped at `tb`, and capped at ~half the
    # rounded batch so the "parallel" grid axis has >= 2 steps when B is large
    # enough (dual-TensorCore sharding on v7x).
    b8 = _round_up(B, 8)
    half = _round_up(pl.cdiv(b8, 2), 8)
    tb_eff = max(8, min(tb, half))
    n_tiles = pl.cdiv(B, tb_eff)
    Bp = n_tiles * tb_eff

    # Narrow HBM-facing input: batch padded to Bp, features padded only 3 -> 8.
    xp = _pad2d(x, Bp, IN_PAD)

    in_act_spec = pl.BlockSpec((tb_eff, IN_PAD), lambda i: (i, 0))
    out_act_spec = pl.BlockSpec((tb_eff, OUT_PAD), lambda i: (i, 0))
    # Tiny grid-invariant operands: whole-array VMEM residency, no double buffers.
    resident = pl.BlockSpec(memory_space=pltpu.MemorySpace.VMEM)

    out_padded = pl.pallas_call(
        mlp3_kernel,
        out_shape=jax.ShapeDtypeStruct((Bp, OUT_PAD), x.dtype),
        grid=(n_tiles,),
        in_specs=[in_act_spec, resident, resident, resident, resident, resident, resident],
        out_specs=out_act_spec,
        compiler_params=pltpu.CompilerParams(
            dimension_semantics=("parallel",),
        ),
    )(xp, w1p, b1p, w2p, b2p, w3p, b3p)

    return out_padded[:B, :3]


def init_params(key):
    # Deterministic init mimicking PyTorch nn.Linear default
    # (uniform(-1/sqrt(fan_in), 1/sqrt(fan_in))); weights stored [in, out].
    def linear(key, fan_in, fan_out):
        kw, kb = jax.random.split(key)
        bound = 1.0 / jnp.sqrt(fan_in)
        w = jax.random.uniform(kw, (fan_in, fan_out), jnp.float32, -bound, bound)
        b = jax.random.uniform(kb, (1, fan_out), jnp.float32, -bound, bound)
        return w, b

    k1, k2, k3 = jax.random.split(key, 3)
    w1, b1 = linear(k1, 3, 79)
    w2, b2 = linear(k2, 79, 36)
    w3, b3 = linear(k3, 36, 3)
    return (w1, b1, w2, b2, w3, b3)


if __name__ == "__main__":
    key = jax.random.PRNGKey(0)
    kp, kx = jax.random.split(key)

    params = init_params(kp)
    padded_params = pad_params(params)          # pad once, reuse for every forward
    x = jax.random.normal(kx, (8, 3), dtype=jnp.float32)  # batch=8, in_features=3

    out = mlp3_forward(x, padded_params)
    jax.block_until_ready(out)

    # Reference check in plain JAX (unpadded math)
    w1, b1, w2, b2, w3, b3 = params
    ref = jnp.maximum(x @ w1 + b1, 0.0)
    ref = jnp.maximum(ref @ w2 + b2, 0.0)
    ref = ref @ w3 + b3
    assert out.shape == (8, 3)
    assert jnp.allclose(out, ref, atol=1e-5, rtol=1e-5)

    print("KERNEL_OK")
</pallas_src>

<mosaic_0001>
module attributes {stable_mosaic.version = 11 : i64} {
  func.func @mlp3_kernel(%arg0: i32, %arg1: memref<8x8xf32, #tpu.memory_space<vmem>>, %arg2: memref<8x128xf32, #tpu.memory_space<vmem>>, %arg3: memref<1x128xf32, #tpu.memory_space<vmem>>, %arg4: memref<128x128xf32, #tpu.memory_space<vmem>>, %arg5: memref<1x128xf32, #tpu.memory_space<vmem>>, %arg6: memref<128x8xf32, #tpu.memory_space<vmem>>, %arg7: memref<1x8xf32, #tpu.memory_space<vmem>>, %arg8: memref<8x8xf32, #tpu.memory_space<vmem>>) attributes {dimension_semantics = [#tpu.dimension_semantics<parallel>], iteration_bounds = array<i64: 1>, scalar_prefetch = 0 : i64, scratch_operands = 0 : i64, tpu.core_type = #tpu.core_type<tc>, window_params = [{transform_indices = @transform_0, window_bounds = array<i64: 8, 8>}, {pipeline_mode = #tpu.pipeline_mode<synchronous>, transform_indices = @transform_1, window_bounds = array<i64: 8, 128>}, {pipeline_mode = #tpu.pipeline_mode<synchronous>, transform_indices = @transform_2, window_bounds = array<i64: 1, 128>}, {pipeline_mode = #tpu.pipeline_mode<synchronous>, transform_indices = @transform_3, window_bounds = array<i64: 128, 128>}, {pipeline_mode = #tpu.pipeline_mode<synchronous>, transform_indices = @transform_4, window_bounds = array<i64: 1, 128>}, {pipeline_mode = #tpu.pipeline_mode<synchronous>, transform_indices = @transform_5, window_bounds = array<i64: 128, 8>}, {pipeline_mode = #tpu.pipeline_mode<synchronous>, transform_indices = @transform_6, window_bounds = array<i64: 1, 8>}, {transform_indices = @transform_7, window_bounds = array<i64: 8, 8>}]} {
    %c0 = arith.constant 0 : index
    %c0_0 = arith.constant 0 : index
    %0 = vector.load %arg1[%c0, %c0_0] : memref<8x8xf32, #tpu.memory_space<vmem>>, vector<8x8xf32>
    %c0_1 = arith.constant 0 : index
    %c0_2 = arith.constant 0 : index
    %1 = vector.load %arg2[%c0_1, %c0_2] : memref<8x128xf32, #tpu.memory_space<vmem>>, vector<8x128xf32>
    %cst = arith.constant dense<0.000000e+00> : vector<8x128xf32>
    %2 = tpu.matmul %0, %1, %cst {dimension_numbers = #tpu.dot_dimension_numbers<[1], [0], [0], [1], [0, 0, 1, 1], [], []>} : vector<8x8xf32>, vector<8x128xf32>, vector<8x128xf32> -> vector<8x128xf32>
    %c0_3 = arith.constant 0 : index
    %c0_4 = arith.constant 0 : index
    %3 = vector.load %arg3[%c0_3, %c0_4] : memref<1x128xf32, #tpu.memory_space<vmem>>, vector<1x128xf32>
    %4 = vector.broadcast %3 : vector<1x128xf32> to vector<8x128xf32>
    %5 = arith.addf %2, %4 : vector<8x128xf32>
    %cst_5 = arith.constant 0.000000e+00 : f32
    %6 = vector.broadcast %cst_5 : f32 to vector<8x128xf32>
    %7 = arith.maximumf %5, %6 : vector<8x128xf32>
    %c0_6 = arith.constant 0 : index
    %c0_7 = arith.constant 0 : index
    %8 = vector.load %arg4[%c0_6, %c0_7] : memref<128x128xf32, #tpu.memory_space<vmem>>, vector<128x128xf32>
    %cst_8 = arith.constant dense<0.000000e+00> : vector<8x128xf32>
    %9 = tpu.matmul %7, %8, %cst_8 {dimension_numbers = #tpu.dot_dimension_numbers<[1], [0], [0], [1], [0, 0, 1, 1], [], []>} : vector<8x128xf32>, vector<128x128xf32>, vector<8x128xf32> -> vector<8x128xf32>
    %c0_9 = arith.constant 0 : index
    %c0_10 = arith.constant 0 : index
    %10 = vector.load %arg5[%c0_9, %c0_10] : memref<1x128xf32, #tpu.memory_space<vmem>>, vector<1x128xf32>
    %11 = vector.broadcast %10 : vector<1x128xf32> to vector<8x128xf32>
    %12 = arith.addf %9, %11 : vector<8x128xf32>
    %cst_11 = arith.constant 0.000000e+00 : f32
    %13 = vector.broadcast %cst_11 : f32 to vector<8x128xf32>
    %14 = arith.maximumf %12, %13 : vector<8x128xf32>
    %c0_12 = arith.constant 0 : index
    %c0_13 = arith.constant 0 : index
    %15 = vector.load %arg6[%c0_12, %c0_13] : memref<128x8xf32, #tpu.memory_space<vmem>>, vector<128x8xf32>
    %cst_14 = arith.constant dense<0.000000e+00> : vector<8x8xf32>
    %16 = tpu.matmul %14, %15, %cst_14 {dimension_numbers = #tpu.dot_dimension_numbers<[1], [0], [0], [1], [0, 0, 1, 1], [], []>} : vector<8x128xf32>, vector<128x8xf32>, vector<8x8xf32> -> vector<8x8xf32>
    %c0_15 = arith.constant 0 : index
    %c0_16 = arith.constant 0 : index
    %17 = vector.load %arg7[%c0_15, %c0_16] : memref<1x8xf32, #tpu.memory_space<vmem>>, vector<1x8xf32>
    %18 = vector.broadcast %17 : vector<1x8xf32> to vector<8x8xf32>
    %19 = arith.addf %16, %18 : vector<8x8xf32>
    %c0_17 = arith.constant 0 : index
    %c0_18 = arith.constant 0 : index
    %20 = vector.load %arg8[%c0_17, %c0_18] : memref<8x8xf32, #tpu.memory_space<vmem>>, vector<8x8xf32>
    tpu.vector_store %arg8[%c0_17, %c0_18], %19 {strides = array<i32>} : memref<8x8xf32, #tpu.memory_space<vmem>>, vector<8x8xf32>,
    return
  }
  func.func @transform_0(%arg0: i32) -> (i32, i32) {
    %c0_i32 = arith.constant 0 : i32
    %c0_i32_0 = arith.constant 0 : i32
    return %arg0, %c0_i32 : i32, i32
  }
  func.func @transform_1(%arg0: i32) -> (i32, i32) {
    %c0_i32 = arith.constant 0 : i32
    %c0_i32_0 = arith.constant 0 : i32
    %c0_i32_1 = arith.constant 0 : i32
    return %c0_i32, %c0_i32_0 : i32, i32
  }
  func.func @transform_2(%arg0: i32) -> (i32, i32) {
    %c0_i32 = arith.constant 0 : i32
    %c0_i32_0 = arith.constant 0 : i32
    %c0_i32_1 = arith.constant 0 : i32
    return %c0_i32, %c0_i32_0 : i32, i32
  }
  func.func @transform_3(%arg0: i32) -> (i32, i32) {
    %c0_i32 = arith.constant 0 : i32
    %c0_i32_0 = arith.constant 0 : i32
    %c0_i32_1 = arith.constant 0 : i32
    return %c0_i32, %c0_i32_0 : i32, i32
  }
  func.func @transform_4(%arg0: i32) -> (i32, i32) {
    %c0_i32 = arith.constant 0 : i32
    %c0_i32_0 = arith.constant 0 : i32
    %c0_i32_1 = arith.constant 0 : i32
    return %c0_i32, %c0_i32_0 : i32, i32
  }
  func.func @transform_5(%arg0: i32) -> (i32, i32) {
    %c0_i32 = arith.constant 0 : i32
    %c0_i32_0 = arith.constant 0 : i32
    %c0_i32_1 = arith.constant 0 : i32
    return %c0_i32, %c0_i32_0 : i32, i32
  }
  func.func @transform_6(%arg0: i32) -> (i32, i32) {
    %c0_i32 = arith.constant 0 : i32
    %c0_i32_0 = arith.constant 0 : i32
    %c0_i32_1 = arith.constant 0 : i32
    return %c0_i32, %c0_i32_0 : i32, i32
  }
  func.func @transform_7(%arg0: i32) -> (i32, i32) {
    %c0_i32 = arith.constant 0 : i32
    %c0_i32_0 = arith.constant 0 : i32
    return %arg0, %c0_i32 : i32, i32
  }
}

</mosaic_0001>

<bundles_post_ra>
// kernel: mlp3_forward.1
= control target key start
LH: loop header
LB: loop body
LE: loop exit
PB: predicated region body
PF: predicated region fallthrough
CT: control target
= control target key end

     0   :  { %vm35_vm0 = vcmask 64512   ;;  %v468_v0 = vmov 0.0   ;;  %vm469_vm1 = vmmov 0   ;;  %v470_v4 = vmov 0.0|0.0   ;;  %s643_s1 = inlined_call_operand.vmem [shape: f32[8,128], index: 1, kind: input, shape index: {}]   ;;  %s644_s0 = inlined_call_operand.vmem [shape: f32[8,8], index: 0, kind: input, shape index: {}]   ;;  %s645_s3 = inlined_call_operand.vmem [shape: f32[128,128], index: 3, kind: input, shape index: {}]   ;;  %s646_s5 = inlined_call_operand.vmem [shape: f32[128,8], index: 5, kind: input, shape index: {}]   ;;  %s647_s2 = inlined_call_operand.vmem [shape: f32[1,128], index: 2, kind: input, shape index: {}]   ;;  %s648_s4 = inlined_call_operand.vmem [shape: f32[1,128], index: 4, kind: input, shape index: {}]   ;;  %s649_s6 = inlined_call_operand.vmem [shape: f32[1,8], index: 6, kind: input, shape index: {}]   ;;  %s650_s7 = inlined_call_operand.vmem [shape: f32[8,8], index: 7, kind: output, shape index: {}]  }
   0x1   :  { %342 = vmatprep.subr.mxu0 %v468_v0  ;;  %v27_v1 = vld [vmem:[%s643_s1] sm:$0xff]  ;;  %344 = vmatprep.mubr.msk.f32.mxu0 %vm469_vm1, %v468_v0  ;;  %v111_v5 = vld [vmem:[%s645_s3 + $0x8] sm:$0xff]  ;;  %v112_v6 = vld [vmem:[%s645_s3 + $0x10] sm:$0xff] }
   0x2   :  { %v26_v2 = vld [vmem:[%s644_s0] sm:$0xff]  ;;  %343 = vmatpush3.msra.mxu0 %v27_v1  ;;  %417 = vmatprep.subr.bf16.mxu1 %v470_v4  ;;  %v113_v7 = vld [vmem:[%s645_s3 + $0x18] sm:$0xff]  ;;  %v115_v11 = vld [vmem:[%s645_s3 + $0x28] sm:$0xff] }
   0x3   :  { %v110_v3 = vld [vmem:[%s645_s3] sm:$0xff]  ;;  %345 = vmatmul.mubr.msk.f32.vlgmr.msra.gmra.mrb[0].mxu0 %vm35_vm0, %v26_v2  ;;  %379 = vmatprep.mubr.msk.f32.mxu1 %vm469_vm1, %v468_v0  ;;  %v421_v9 = vpack.c.bf16 %v113_v7, %v112_v6  ;;  %v116_v13 = vld [vmem:[%s645_s3 + $0x30] sm:$0xff]  ;;  %v117_v14 = vld [vmem:[%s645_s3 + $0x38] sm:$0xff] }
   0x4   :  { %v418_v8 = vpack.c.bf16 %v111_v5, %v110_v3  ;;  %441 = vmatprep.subr.bf16.mxu0 %v470_v4  ;;  %414 = vmatprep.mubr.msk.f32.mxu0 %vm469_vm1, %v468_v0  ;;  %v114_v10 = vld [vmem:[%s645_s3 + $0x20] sm:$0xff]  ;;  %v427_v15 = vpack.c.bf16 %v117_v14, %v116_v13  ;;  %v119_v17 = vld [vmem:[%s645_s3 + $0x48] sm:$0xff]  ;;  %v120_v19 = vld [vmem:[%s645_s3 + $0x50] sm:$0xff] }
   0x5   :  { %v424_v12 = vpack.c.bf16 %v115_v11, %v114_v10  ;;  %v118_v16 = vld [vmem:[%s645_s3 + $0x40] sm:$0xff]  ;;  %v121_v20 = vld [vmem:[%s645_s3 + $0x58] sm:$0xff]  ;;  %v123_v23 = vld [vmem:[%s645_s3 + $0x68] sm:$0xff] }
   0x6   :  { %419 = vmatpush3.bf16.msra.mxu1 %v418_v8  ;;  %v430_v18 = vpack.c.bf16 %v119_v17, %v118_v16  ;;  %v433_v21 = vpack.c.bf16 %v121_v20, %v120_v19  ;;  %v122_v22 = vld [vmem:[%s645_s3 + $0x60] sm:$0xff]  ;;  %v124_v25 = vld [vmem:[%s645_s3 + $0x70] sm:$0xff]  ;;  %v125_v26 = vld [vmem:[%s645_s3 + $0x78] sm:$0xff] }
   0x7   :  { %420 = vmatprep.subr.bf16.mxu1 %v470_v4  ;;  %v436_v24 = vpack.c.bf16 %v123_v23, %v122_v22  ;;  %v439_v27 = vpack.c.bf16 %v125_v26, %v124_v25  ;;  %v204_v28 = vld [vmem:[%s646_s5] sm:$0xff]  ;;  %v205_v29 = vld [vmem:[%s646_s5 + $0x8] sm:$0xff]  ;;  %v206_v30 = vld [vmem:[%s646_s5 + $0x10] sm:$0xff] }
   0x8   :  { %v442_v31 = vpack.c.bf16 %v205_v29, %v204_v28  ;;  %v207_v32 = vld [vmem:[%s646_s5 + $0x18] sm:$0xff]  ;;  %v208_v34 = vld [vmem:[%s646_s5 + $0x20] sm:$0xff]  ;;  %v209_v35 = vld [vmem:[%s646_s5 + $0x28] sm:$0xff] }
   0x9   :  { %v445_v33 = vpack.c.bf16 %v207_v32, %v206_v30  ;;  %v448_v36 = vpack.c.bf16 %v209_v35, %v208_v34  ;;  %v210_v37 = vld [vmem:[%s646_s5 + $0x30] sm:$0xff]  ;;  %v211_v38 = vld [vmem:[%s646_s5 + $0x38] sm:$0xff]  ;;  %v212_v40 = vld [vmem:[%s646_s5 + $0x40] sm:$0xff] }
   0xa   :  { %422 = vmatpush3.bf16.msra.mxu1 %v421_v9  ;;  %443 = vmatpush3.bf16.msra.mxu0 %v442_v31  ;;  %v451_v39 = vpack.c.bf16 %v211_v38, %v210_v37  ;;  %v213_v41 = vld [vmem:[%s646_s5 + $0x48] sm:$0xff]  ;;  %v214_v43 = vld [vmem:[%s646_s5 + $0x50] sm:$0xff]  ;;  %v215_v44 = vld [vmem:[%s646_s5 + $0x58] sm:$0xff] }
   0xb   :  { %423 = vmatprep.subr.bf16.mxu1 %v470_v4  ;;  %444 = vmatprep.subr.bf16.mxu0 %v470_v4  ;;  %v454_v42 = vpack.c.bf16 %v213_v41, %v212_v40  ;;  %v457_v45 = vpack.c.bf16 %v215_v44, %v214_v43  ;;  %v216_v46 = vld [vmem:[%s646_s5 + $0x60] sm:$0xff]  ;;  %v217_v47 = vld [vmem:[%s646_s5 + $0x68] sm:$0xff]  ;;  %v218_v54 = vld [vmem:[%s646_s5 + $0x70] sm:$0xff] }
   0xc   :  { %v460_v48 = vpack.c.bf16 %v217_v47, %v216_v46  ;;  %v302_v49 = vld [vmem:[%s647_s2] ss:$0 sm:$0xff]  ;;  %v219_v55 = vld [vmem:[%s646_s5 + $0x78] sm:$0xff] }
   0xd   :  { %v463_v56 = vpack.c.bf16 %v219_v55, %v218_v54  ;;  %v304_v57 = vld [vmem:[%s648_s4] ss:$0 sm:$0xff] }
   0xe   :  { %425 = vmatpush3.bf16.msra.mxu1 %v424_v12  ;;  %446 = vmatpush3.bf16.msra.mxu0 %v445_v33  ;;  %v305_v62 = vld [vmem:[%s649_s6] ss:$0 sm:$0xff] }
   0xf   :  { %426 = vmatprep.subr.bf16.mxu1 %v470_v4  ;;  %447 = vmatprep.subr.bf16.mxu0 %v470_v4 }
  0x12   :  { %428 = vmatpush3.bf16.msra.mxu1 %v427_v15  ;;  %449 = vmatpush3.bf16.msra.mxu0 %v448_v36 }
  0x13   :  { %429 = vmatprep.subr.bf16.mxu1 %v470_v4  ;;  %450 = vmatprep.subr.bf16.mxu0 %v470_v4 }
  0x16   :  { %431 = vmatpush3.bf16.msra.mxu1 %v430_v18  ;;  %452 = vmatpush3.bf16.msra.mxu0 %v451_v39 }
  0x17   :  { %432 = vmatprep.subr.bf16.mxu1 %v470_v4  ;;  %453 = vmatprep.subr.bf16.mxu0 %v470_v4 }
  0x1a   :  { %434 = vmatpush3.bf16.msra.mxu1 %v433_v21  ;;  %455 = vmatpush3.bf16.msra.mxu0 %v454_v42 }
  0x1b   :  { %435 = vmatprep.subr.bf16.mxu1 %v470_v4  ;;  %456 = vmatprep.subr.bf16.mxu0 %v470_v4 }
  0x1e   :  { %437 = vmatpush3.bf16.msra.mxu1 %v436_v24  ;;  %458 = vmatpush3.bf16.msra.mxu0 %v457_v45 }
  0x1f   :  { %438 = vmatprep.subr.bf16.mxu1 %v470_v4  ;;  %459 = vmatprep.subr.bf16.mxu0 %v470_v4 }
  0x22   :  { %440 = vmatpush3.bf16.msra.mxu1 %v439_v27  ;;  %461 = vmatpush3.bf16.msra.mxu0 %v460_v48 }
  0x23   :  { %462 = vmatprep.subr.bf16.mxu0 %v470_v4 }
  0x26   :  { %464 = vmatpush3.bf16.msra.mxu0 %v463_v56 }
  0xd6   :  { %v105_v50 = vpop.f32.mrb[0].mxu0 }
  0xd7   :  { %v106_v51 = vadd.f32 %v302_v49, %v105_v50  ;;  %v346_v52 = vpop.f32.mrb[1].mxu0 }
  0xd9   :  { %v109_v53 = vmax.f32 %v106_v51, 0.0 }
  0xdb   :  { %380 = vmatmul.mubr.f32.vlgmr.msra.gmra.mrb[0].mxu1 %v109_v53 }
 0x1ae   :  { %v199_v58 = vpop.f32.mrb[0].mxu1 }
 0x1af   :  { %v200_v59 = vadd.f32 %v304_v57, %v199_v58  ;;  %v381_v60 = vpop.f32.mrb[1].mxu1 }
 0x1b1   :  { %v203_v61 = vmax.f32 %v200_v59, 0.0 }
 0x1b3   :  { %415 = vmatmul.mubr.f32.vlgmr.msra.gmra.mrb[2].mxu0 %v203_v61 }
 0x286   :  { %v293_v63 = vpop.f32.mrb[2].mxu0 }
 0x287   :  { %v294_v0 = vadd.f32 %v305_v62, %v293_v63  ;;  %v416_v1 = vpop.f32.mrb[3].mxu0 }
 0x289   :  { %297 = vst.msk [vmem:[%s650_s7] sm:$0xff] %vm35_vm0, %v294_v0 }

</bundles_post_ra>
